<compile_context>
chip_gen: v6e
topology: v6e:2x2x1
jax: 0.10.0
libtpu: 0.0.40
codegen_flags: <defaults>
</compile_context>

<pallas_src>
import math
import functools

import jax
import jax.numpy as jnp
from jax import lax
from jax.experimental import pallas as pl
from jax.experimental.pallas import tpu as pltpu


# ---------------------------------------------------------------------------
# Kernel
# ---------------------------------------------------------------------------
def _sdpa_kernel(q_ref, k_ref, v_ref, *rest, inv_sqrt_dk, has_mask, causal, tq):
    if has_mask:
        mask_ref, ctx_ref, attn_ref = rest
    else:
        ctx_ref, attn_ref = rest

    q = q_ref[0, 0]            # [TQ, d_k]  native dtype -> MXU (bf16 stays bf16)
    k = k_ref[0, 0]            # [S,  d_k]
    v = v_ref[0, 0]            # [S,  d_k]

    # scores = Q @ K^T — contract the trailing d_k axes directly (no K
    # transpose / XLU round-trip), f32 accumulation on the MXU.
    scores = lax.dot_general(
        q, k, (((1,), (1,)), ((), ())),
        preferred_element_type=jnp.float32)              # [TQ, S] f32
    # Scale in f32 after the matmul: matches torch `matmul(...)/sqrt(d_k)`
    # numerics (no bf16 pre-rounding of Q); the TQ*S VPU muls hide under the
    # MXU / HBM-writeback critical path.
    scores = scores * jnp.float32(inv_sqrt_dk)

    if has_mask:
        # nonzero == masked out (torch masked_fill_ semantics); mask streams
        # as bool / int8 (1 byte per element).
        scores = jnp.where(mask_ref[0, 0] != 0, jnp.float32(-1.0e9), scores)
    if causal:
        qi = pl.program_id(2)
        row = qi * tq + lax.broadcasted_iota(jnp.int32, scores.shape, 0)
        col = lax.broadcasted_iota(jnp.int32, scores.shape, 1)
        scores = jnp.where(col > row, jnp.float32(-1.0e9), scores)

    # Numerically stable softmax over keys (f32 math throughout).
    m = jnp.max(scores, axis=-1, keepdims=True)
    e = jnp.exp(scores - m)
    denom = jnp.sum(e, axis=-1, keepdims=True)
    # EUP approximate reciprocal + one Newton step: rows sum to 1 at ~f32
    # precision for only TQ extra ops per row.
    inv = pl.reciprocal(denom, approx=True)
    inv = inv * (2.0 - denom * inv)
    attn = e * inv                                       # [TQ, S] f32

    # context = attention @ V (attention cast to V's dtype -> bf16 MXU path
    # for bf16 inputs), f32 accumulation.
    ctx = lax.dot_general(
        attn.astype(v.dtype), v, (((1,), (0,)), ((), ())),
        preferred_element_type=jnp.float32)              # [TQ, d_k]

    attn_ref[0, 0] = attn.astype(attn_ref.dtype)
    ctx_ref[0, 0] = ctx.astype(ctx_ref.dtype)


# ---------------------------------------------------------------------------
# VMEM budgeting / tile selection
# ---------------------------------------------------------------------------
def _vmem_budget_bytes():
    """~75% of physical VMEM: ~96 MiB on v5e/v6e, ~48 MiB on v7x."""
    phys = 64 * 1024 * 1024            # conservative default (v7x per-core)
    try:
        phys = pltpu.get_tpu_info().vmem_capacity_bytes
    except Exception:
        pass
    return int(phys) * 3 // 4


def _vmem_bytes(tq, S, d_k, in_isz, out_isz, mask_isz, kv_single_buffered):
    kv_buf = 1 if kv_single_buffered else 2
    kv = kv_buf * 2 * S * d_k * in_isz         # K + V residency
    qb = 2 * tq * d_k * in_isz                 # Q, double-buffered
    mk = 2 * tq * S * mask_isz                 # mask, double-buffered (0 if none)
    co = 2 * tq * d_k * out_isz                # context out, double-buffered
    ao = 2 * tq * S * out_isz                  # attention out, double-buffered
    tmp = 3 * tq * S * 4                       # f32 scores / exp / attn temps
    return kv + qb + mk + co + ao + tmp


def _select_tq(S, block_q, in_isz, bytes_fn, budget):
    cands = [c for c in (512, 256, 128, 64, 32, 16, 8)
             if block_q is None or c <= block_q]
    if not cands:
        cands = [max(8, int(block_q))]
    if S <= cands[0]:
        cands = [S] + cands                    # short sequences: one tile/(b,h)
    # bf16 / int8 inputs need sublane-packed tiles (multiples of 16 / 32)
    sublane_min = {4: 8, 2: 16, 1: 32}.get(in_isz, 8)

    # Pass 1: prefer tiles that divide S (no ragged tail) and fit the budget.
    for c in cands:
        if c <= S and S % c == 0 and (c == S or c % sublane_min == 0) \
                and bytes_fn(c) <= budget:
            return c
    # Pass 2: any tile that fits; ragged tail handled by a cdiv grid (the last
    # block's OOB reads are padded and its OOB writes are clipped by Pallas).
    for c in cands:
        c = min(c, S)
        if (c == S or c % sublane_min == 0) and bytes_fn(c) <= budget:
            return c
    return min(8, S)                            # last resort


# ---------------------------------------------------------------------------
# Wrapper
# ---------------------------------------------------------------------------
def scaled_dot_product_attention(Q, K, V, mask=None, *, causal=False, block_q=None):
    """Pallas TPU implementation of ScaledDotProductAttention.forward.

    Q, K, V: [B, H, S, d_k].  mask: optional [B, H, S, S]; nonzero entries get
    -1e9 before softmax.  Pass bool / int8 masks to avoid any wrapper-side
    conversion pass (wider dtypes are converted with (mask != 0), never by a
    wrapping astype).  causal=True applies an in-kernel causal mask with no
    mask array read from HBM.  Returns (context, attention) in Q.dtype.
    """
    B, H, S, d_k = Q.shape
    out_dtype = Q.dtype
    in_isz = jnp.dtype(Q.dtype).itemsize
    out_isz = jnp.dtype(out_dtype).itemsize

    # Mask handling: stream 1-byte masks as-is; only convert wider dtypes, and
    # do so via (mask != 0) so values like 256 can never wrap to "unmasked".
    has_mask = mask is not None
    mask_in = None
    mask_isz = 0
    if has_mask:
        if mask.dtype in (jnp.bool_, jnp.int8, jnp.uint8):
            mask_in = mask
        else:
            mask_in = (mask != 0).astype(jnp.int8)
        mask_isz = 1

    budget = _vmem_budget_bytes()
    bytes_fn = lambda tq: _vmem_bytes(tq, S, d_k, in_isz, out_isz, mask_isz,
                                      kv_single_buffered=True)
    tq = _select_tq(S, block_q, in_isz, bytes_fn, budget)
    num_q = pl.cdiv(S, tq)
    grid = (B, H, num_q)

    kernel = functools.partial(
        _sdpa_kernel, inv_sqrt_dk=1.0 / math.sqrt(d_k),
        has_mask=has_mask, causal=causal, tq=tq)

    q_spec = pl.BlockSpec((1, 1, tq, d_k), lambda b, h, qi: (b, h, qi, 0))
    row_spec = pl.BlockSpec((1, 1, tq, S), lambda b, h, qi: (b, h, qi, 0))

    # Shard megacore over B*H ("arbitrary" qi keeps each (b,h)'s K/V read once
    # per core); only parallelize qi when there is no B*H parallelism.
    dims = ("parallel", "parallel", "arbitrary" if B * H >= 2 else "parallel")

    cost = pl.CostEstimate(
        flops=4 * B * H * S * S * d_k,
        transcendentals=B * H * S * S,
        bytes_accessed=(4 * B * H * S * d_k * in_isz          # Q, K, V, ctx
                        + B * H * S * S * out_isz             # attention out
                        + B * H * S * S * mask_isz),          # mask stream
    )

    def run(kv_single_buffered):
        kv_map = lambda b, h, qi: (b, h, 0, 0)
        if kv_single_buffered:
            # K/V block index is constant across qi -> second buffer is pure
            # VMEM waste; single-buffer them (key on v7x's 64 MiB VMEM).
            kv_spec = pl.BlockSpec((1, 1, S, d_k), kv_map,
                                   pipeline_mode=pl.Buffered(1))
        else:
            kv_spec = pl.BlockSpec((1, 1, S, d_k), kv_map)
        in_specs = [q_spec, kv_spec, kv_spec]
        inputs = [Q, K, V]
        if has_mask:
            in_specs.append(row_spec)
            inputs.append(mask_in)
        return pl.pallas_call(
            kernel,
            out_shape=(
                jax.ShapeDtypeStruct((B, H, S, d_k), out_dtype),   # context
                jax.ShapeDtypeStruct((B, H, S, S), out_dtype),     # attention
            ),
            grid_spec=pltpu.PrefetchScalarGridSpec(
                num_scalar_prefetch=0,
                grid=grid,
                in_specs=in_specs,
                out_specs=(q_spec, row_spec)),
            compiler_params=pltpu.CompilerParams(
                dimension_semantics=dims,
                vmem_limit_bytes=budget),
            cost_estimate=cost,
        )(*inputs)

    try:
        ctx, attn = run(True)
    except Exception:
        # pl.Buffered(1) (single-buffered K/V) unsupported on this jax
        # version -> fall back to default double-buffering.
        ctx, attn = run(False)
    return ctx, attn


# ---------------------------------------------------------------------------
# Reference + demo
# ---------------------------------------------------------------------------
def _reference(Q, K, V, mask, d_k):
    Qf, Kf, Vf = (x.astype(jnp.float32) for x in (Q, K, V))
    scores = jnp.einsum("bhqd,bhkd->bhqk", Qf, Kf) / math.sqrt(d_k)
    if mask is not None:
        scores = jnp.where(mask != 0, -1.0e9, scores)
    attn = jax.nn.softmax(scores, axis=-1)
    ctx = jnp.einsum("bhqk,bhkd->bhqd", attn, Vf)
    return ctx, attn


if __name__ == "__main__":
    B, H, S, d_k = 2, 2, 8, 32   # small shapes consistent with the module

    key = jax.random.PRNGKey(0)
    kq, kk, kv = jax.random.split(key, 3)
    Q = jax.random.normal(kq, (B, H, S, d_k), dtype=jnp.float32)
    K = jax.random.normal(kk, (B, H, S, d_k), dtype=jnp.float32)
    V = jax.random.normal(kv, (B, H, S, d_k), dtype=jnp.float32)

    # Causal mask: 1 where attention is NOT allowed (upper triangle).
    causal_tri = jnp.triu(jnp.ones((S, S), dtype=jnp.int32), k=1)
    mask_i32 = jnp.broadcast_to(causal_tri, (B, H, S, S))
    mask_i8 = mask_i32.astype(jnp.int8)

    tol = dict(atol=5e-3, rtol=5e-3)

    # 1) int32 mask (converted via (mask != 0) -> int8; values never wrap)
    ctx, attn = scaled_dot_product_attention(Q, K, V, mask_i32)
    jax.block_until_ready((ctx, attn))
    ctx_r, attn_r = _reference(Q, K, V, mask_i32, d_k)
    assert jnp.allclose(ctx, ctx_r, **tol)
    assert jnp.allclose(attn, attn_r, **tol)

    # 2) int8 mask streamed as-is (no wrapper-side cast / extra HBM pass)
    ctx, attn = scaled_dot_product_attention(Q, K, V, mask_i8)
    jax.block_until_ready((ctx, attn))
    assert jnp.allclose(ctx, ctx_r, **tol)
    assert jnp.allclose(attn, attn_r, **tol)

    # 3) mask=None (no mask DMA, no zero-mask allocation)
    ctx, attn = scaled_dot_product_attention(Q, K, V, None)
    jax.block_until_ready((ctx, attn))
    ctx_r2, attn_r2 = _reference(Q, K, V, None, d_k)
    assert jnp.allclose(ctx, ctx_r2, **tol)
    assert jnp.allclose(attn, attn_r2, **tol)

    # 4) in-kernel causal path (mask built from iota, no mask array at all)
    ctx, attn = scaled_dot_product_attention(Q, K, V, None, causal=True)
    jax.block_until_ready((ctx, attn))
    assert jnp.allclose(ctx, ctx_r, **tol)
    assert jnp.allclose(attn, attn_r, **tol)

    # 5) bf16 inputs: bf16 MXU operands, f32 softmax, bf16 outputs.
    Qb, Kb, Vb = (x.astype(jnp.bfloat16) for x in (Q, K, V))
    ctxb, attnb = scaled_dot_product_attention(Qb, Kb, Vb, mask_i8)
    jax.block_until_ready((ctxb, attnb))
    ctx_rb, attn_rb = _reference(Qb, Kb, Vb, mask_i8, d_k)
    assert ctxb.dtype == jnp.bfloat16 and attnb.dtype == jnp.bfloat16
    assert jnp.allclose(ctxb.astype(jnp.float32), ctx_rb, atol=5e-2, rtol=5e-2)
    assert jnp.allclose(attnb.astype(jnp.float32), attn_rb, atol=5e-2, rtol=5e-2)

    print("KERNEL_OK")
</pallas_src>

<mosaic_0001>
module attributes {stable_mosaic.version = 11 : i64} {
  func.func @_sdpa_kernel(%arg0: i32, %arg1: i32, %arg2: i32, %arg3: memref<1x1x8x32xf32, #tpu.memory_space<vmem>>, %arg4: memref<1x1x8x32xf32, #tpu.memory_space<vmem>>, %arg5: memref<1x1x8x32xf32, #tpu.memory_space<vmem>>, %arg6: memref<1x1x8x8xi8, #tpu.memory_space<vmem>>, %arg7: memref<1x1x8x32xf32, #tpu.memory_space<vmem>>, %arg8: memref<1x1x8x8xf32, #tpu.memory_space<vmem>>) attributes {dimension_semantics = [#tpu.dimension_semantics<parallel>, #tpu.dimension_semantics<parallel>, #tpu.dimension_semantics<arbitrary>], iteration_bounds = array<i64: 2, 2, 1>, scalar_prefetch = 0 : i64, scratch_operands = 0 : i64, tpu.core_type = #tpu.core_type<tc>, window_params = [{transform_indices = @transform_0, window_bounds = array<i64: 1, 1, 8, 32>}, {pipeline_mode = #tpu.pipeline_mode<synchronous>, transform_indices = @transform_1, window_bounds = array<i64: 1, 1, 8, 32>}, {pipeline_mode = #tpu.pipeline_mode<synchronous>, transform_indices = @transform_2, window_bounds = array<i64: 1, 1, 8, 32>}, {transform_indices = @transform_3, window_bounds = array<i64: 1, 1, 8, 8>}, {transform_indices = @transform_4, window_bounds = array<i64: 1, 1, 8, 32>}, {transform_indices = @transform_5, window_bounds = array<i64: 1, 1, 8, 8>}]} {
    %c0 = arith.constant 0 : index
    %c0_0 = arith.constant 0 : index
    %c0_1 = arith.constant 0 : index
    %c0_2 = arith.constant 0 : index
    %0 = vector.load %arg3[%c0, %c0_0, %c0_1, %c0_2] : memref<1x1x8x32xf32, #tpu.memory_space<vmem>>, vector<1x1x8x32xf32>
    %1 = vector.shape_cast %0 : vector<1x1x8x32xf32> to vector<8x32xf32>
    %c0_3 = arith.constant 0 : index
    %c0_4 = arith.constant 0 : index
    %c0_5 = arith.constant 0 : index
    %c0_6 = arith.constant 0 : index
    %2 = vector.load %arg4[%c0_3, %c0_4, %c0_5, %c0_6] : memref<1x1x8x32xf32, #tpu.memory_space<vmem>>, vector<1x1x8x32xf32>
    %3 = vector.shape_cast %2 : vector<1x1x8x32xf32> to vector<8x32xf32>
    %c0_7 = arith.constant 0 : index
    %c0_8 = arith.constant 0 : index
    %c0_9 = arith.constant 0 : index
    %c0_10 = arith.constant 0 : index
    %4 = vector.load %arg5[%c0_7, %c0_8, %c0_9, %c0_10] : memref<1x1x8x32xf32, #tpu.memory_space<vmem>>, vector<1x1x8x32xf32>
    %5 = vector.shape_cast %4 : vector<1x1x8x32xf32> to vector<8x32xf32>
    %cst = arith.constant dense<0.000000e+00> : vector<8x8xf32>
    %6 = tpu.matmul %1, %3, %cst {dimension_numbers = #tpu.dot_dimension_numbers<[1], [1], [0], [0], [0, 0, 1, 0], [], []>} : vector<8x32xf32>, vector<8x32xf32>, vector<8x8xf32> -> vector<8x8xf32>
    %cst_11 = arith.constant 0.176776692 : f32
    %7 = vector.broadcast %cst_11 : f32 to vector<8x8xf32>
    %8 = arith.mulf %6, %7 : vector<8x8xf32>
    %c0_12 = arith.constant 0 : index
    %c0_13 = arith.constant 0 : index
    %c0_14 = arith.constant 0 : index
    %c0_15 = arith.constant 0 : index
    %9 = vector.load %arg6[%c0_12, %c0_13, %c0_14, %c0_15] : memref<1x1x8x8xi8, #tpu.memory_space<vmem>>, vector<1x1x8x8xi8>
    %10 = vector.shape_cast %9 : vector<1x1x8x8xi8> to vector<8x8xi8>
    %c0_i8 = arith.constant 0 : i8
    %11 = vector.broadcast %c0_i8 : i8 to vector<8x8xi8>
    %12 = arith.cmpi ne, %10, %11 : vector<8x8xi8>
    %cst_16 = arith.constant -1.000000e+09 : f32
    %13 = vector.broadcast %cst_16 : f32 to vector<8x8xf32>
    %14 = arith.select %12, %13, %8 : vector<8x8xi1>, vector<8x8xf32>
    %cst_17 = arith.constant dense<0xFF800000> : vector<8xf32>
    %15 = vector.multi_reduction <maximumf>, %14, %cst_17 [1] : vector<8x8xf32> to vector<8xf32>
    %16 = vector.shape_cast %15 : vector<8xf32> to vector<8x1xf32>
    %17 = vector.broadcast %16 : vector<8x1xf32> to vector<8x8xf32>
    %18 = arith.subf %14, %17 : vector<8x8xf32>
    %19 = math.exp %18 : vector<8x8xf32>
    %cst_18 = arith.constant dense<0.000000e+00> : vector<8xf32>
    %20 = vector.multi_reduction <add>, %19, %cst_18 [1] : vector<8x8xf32> to vector<8xf32>
    %21 = vector.shape_cast %20 : vector<8xf32> to vector<8x1xf32>
    %22 = tpu.reciprocal %21 {approx = true} : vector<8x1xf32> -> vector<8x1xf32>
    %23 = arith.mulf %21, %22 : vector<8x1xf32>
    %cst_19 = arith.constant 2.000000e+00 : f32
    %24 = vector.broadcast %cst_19 : f32 to vector<8x1xf32>
    %25 = arith.subf %24, %23 : vector<8x1xf32>
    %26 = arith.mulf %22, %25 : vector<8x1xf32>
    %27 = vector.broadcast %26 : vector<8x1xf32> to vector<8x8xf32>
    %28 = arith.mulf %19, %27 : vector<8x8xf32>
    %cst_20 = arith.constant dense<0.000000e+00> : vector<8x32xf32>
    %29 = tpu.matmul %28, %5, %cst_20 {dimension_numbers = #tpu.dot_dimension_numbers<[1], [0], [0], [1], [0, 0, 1, 1], [], []>} : vector<8x8xf32>, vector<8x32xf32>, vector<8x32xf32> -> vector<8x32xf32>
    %c0_21 = arith.constant 0 : index
    %c0_22 = arith.constant 0 : index
    %c0_23 = arith.constant 0 : index
    %c0_24 = arith.constant 0 : index
    %30 = vector.load %arg8[%c0_21, %c0_22, %c0_23, %c0_24] : memref<1x1x8x8xf32, #tpu.memory_space<vmem>>, vector<1x1x8x8xf32>
    %31 = vector.shape_cast %30 : vector<1x1x8x8xf32> to vector<8x8xf32>
    %32 = vector.shape_cast %28 : vector<8x8xf32> to vector<1x1x8x8xf32>
    tpu.vector_store %arg8[%c0_21, %c0_22, %c0_23, %c0_24], %32 {strides = array<i32>} : memref<1x1x8x8xf32, #tpu.memory_space<vmem>>, vector<1x1x8x8xf32>,
    %c0_25 = arith.constant 0 : index
    %c0_26 = arith.constant 0 : index
    %c0_27 = arith.constant 0 : index
    %c0_28 = arith.constant 0 : index
    %33 = vector.load %arg7[%c0_25, %c0_26, %c0_27, %c0_28] : memref<1x1x8x32xf32, #tpu.memory_space<vmem>>, vector<1x1x8x32xf32>
    %34 = vector.shape_cast %33 : vector<1x1x8x32xf32> to vector<8x32xf32>
    %35 = vector.shape_cast %29 : vector<8x32xf32> to vector<1x1x8x32xf32>
    tpu.vector_store %arg7[%c0_25, %c0_26, %c0_27, %c0_28], %35 {strides = array<i32>} : memref<1x1x8x32xf32, #tpu.memory_space<vmem>>, vector<1x1x8x32xf32>,
    return
  }
  func.func @transform_0(%arg0: i32, %arg1: i32, %arg2: i32) -> (i32, i32, i32, i32) {
    %c0_i32 = arith.constant 0 : i32
    %c0_i32_0 = arith.constant 0 : i32
    return %arg0, %arg1, %arg2, %c0_i32 : i32, i32, i32, i32
  }
  func.func @transform_1(%arg0: i32, %arg1: i32, %arg2: i32) -> (i32, i32, i32, i32) {
    %c0_i32 = arith.constant 0 : i32
    %c0_i32_0 = arith.constant 0 : i32
    %c0_i32_1 = arith.constant 0 : i32
    return %arg0, %arg1, %c0_i32, %c0_i32_0 : i32, i32, i32, i32
  }
  func.func @transform_2(%arg0: i32, %arg1: i32, %arg2: i32) -> (i32, i32, i32, i32) {
    %c0_i32 = arith.constant 0 : i32
    %c0_i32_0 = arith.constant 0 : i32
    %c0_i32_1 = arith.constant 0 : i32
    return %arg0, %arg1, %c0_i32, %c0_i32_0 : i32, i32, i32, i32
  }
  func.func @transform_3(%arg0: i32, %arg1: i32, %arg2: i32) -> (i32, i32, i32, i32) {
    %c0_i32 = arith.constant 0 : i32
    %c0_i32_0 = arith.constant 0 : i32
    return %arg0, %arg1, %arg2, %c0_i32 : i32, i32, i32, i32
  }
  func.func @transform_4(%arg0: i32, %arg1: i32, %arg2: i32) -> (i32, i32, i32, i32) {
    %c0_i32 = arith.constant 0 : i32
    %c0_i32_0 = arith.constant 0 : i32
    return %arg0, %arg1, %arg2, %c0_i32 : i32, i32, i32, i32
  }
  func.func @transform_5(%arg0: i32, %arg1: i32, %arg2: i32) -> (i32, i32, i32, i32) {
    %c0_i32 = arith.constant 0 : i32
    %c0_i32_0 = arith.constant 0 : i32
    return %arg0, %arg1, %arg2, %c0_i32 : i32, i32, i32, i32
  }
}

module attributes {stable_mosaic.version = 11 : i64} {
  func.func @_sdpa_kernel(%arg0: i32, %arg1: i32, %arg2: i32, %arg3: memref<1x1x8x32xf32, #tpu.memory_space<vmem>>, %arg4: memref<1x1x8x32xf32, #tpu.memory_space<vmem>>, %arg5: memref<1x1x8x32xf32, #tpu.memory_space<vmem>>, %arg6: memref<1x1x8x8xi8, #tpu.memory_space<vmem>>, %arg7: memref<1x1x8x32xf32, #tpu.memory_space<vmem>>, %arg8: memref<1x1x8x8xf32, #tpu.memory_space<vmem>>) attributes {dimension_semantics = [#tpu.dimension_semantics<parallel>, #tpu.dimension_semantics<parallel>, #tpu.dimension_semantics<arbitrary>], iteration_bounds = array<i64: 2, 2, 1>, scalar_prefetch = 0 : i64, scratch_operands = 0 : i64, tpu.core_type = #tpu.core_type<tc>, window_params = [{transform_indices = @transform_0, window_bounds = array<i64: 1, 1, 8, 32>}, {transform_indices = @transform_1, window_bounds = array<i64: 1, 1, 8, 32>}, {transform_indices = @transform_2, window_bounds = array<i64: 1, 1, 8, 32>}, {transform_indices = @transform_3, window_bounds = array<i64: 1, 1, 8, 8>}, {transform_indices = @transform_4, window_bounds = array<i64: 1, 1, 8, 32>}, {transform_indices = @transform_5, window_bounds = array<i64: 1, 1, 8, 8>}]} {
    %c0 = arith.constant 0 : index
    %c0_0 = arith.constant 0 : index
    %c0_1 = arith.constant 0 : index
    %c0_2 = arith.constant 0 : index
    %0 = vector.load %arg3[%c0, %c0_0, %c0_1, %c0_2] : memref<1x1x8x32xf32, #tpu.memory_space<vmem>>, vector<1x1x8x32xf32>
    %1 = vector.shape_cast %0 : vector<1x1x8x32xf32> to vector<8x32xf32>
    %c0_3 = arith.constant 0 : index
    %c0_4 = arith.constant 0 : index
    %c0_5 = arith.constant 0 : index
    %c0_6 = arith.constant 0 : index
    %2 = vector.load %arg4[%c0_3, %c0_4, %c0_5, %c0_6] : memref<1x1x8x32xf32, #tpu.memory_space<vmem>>, vector<1x1x8x32xf32>
    %3 = vector.shape_cast %2 : vector<1x1x8x32xf32> to vector<8x32xf32>
    %c0_7 = arith.constant 0 : index
    %c0_8 = arith.constant 0 : index
    %c0_9 = arith.constant 0 : index
    %c0_10 = arith.constant 0 : index
    %4 = vector.load %arg5[%c0_7, %c0_8, %c0_9, %c0_10] : memref<1x1x8x32xf32, #tpu.memory_space<vmem>>, vector<1x1x8x32xf32>
    %5 = vector.shape_cast %4 : vector<1x1x8x32xf32> to vector<8x32xf32>
    %cst = arith.constant dense<0.000000e+00> : vector<8x8xf32>
    %6 = tpu.matmul %1, %3, %cst {dimension_numbers = #tpu.dot_dimension_numbers<[1], [1], [0], [0], [0, 0, 1, 0], [], []>} : vector<8x32xf32>, vector<8x32xf32>, vector<8x8xf32> -> vector<8x8xf32>
    %cst_11 = arith.constant 0.176776692 : f32
    %7 = vector.broadcast %cst_11 : f32 to vector<8x8xf32>
    %8 = arith.mulf %6, %7 : vector<8x8xf32>
    %c0_12 = arith.constant 0 : index
    %c0_13 = arith.constant 0 : index
    %c0_14 = arith.constant 0 : index
    %c0_15 = arith.constant 0 : index
    %9 = vector.load %arg6[%c0_12, %c0_13, %c0_14, %c0_15] : memref<1x1x8x8xi8, #tpu.memory_space<vmem>>, vector<1x1x8x8xi8>
    %10 = vector.shape_cast %9 : vector<1x1x8x8xi8> to vector<8x8xi8>
    %c0_i8 = arith.constant 0 : i8
    %11 = vector.broadcast %c0_i8 : i8 to vector<8x8xi8>
    %12 = arith.cmpi ne, %10, %11 : vector<8x8xi8>
    %cst_16 = arith.constant -1.000000e+09 : f32
    %13 = vector.broadcast %cst_16 : f32 to vector<8x8xf32>
    %14 = arith.select %12, %13, %8 : vector<8x8xi1>, vector<8x8xf32>
    %cst_17 = arith.constant dense<0xFF800000> : vector<8xf32>
    %15 = vector.multi_reduction <maximumf>, %14, %cst_17 [1] : vector<8x8xf32> to vector<8xf32>
    %16 = vector.shape_cast %15 : vector<8xf32> to vector<8x1xf32>
    %17 = vector.broadcast %16 : vector<8x1xf32> to vector<8x8xf32>
    %18 = arith.subf %14, %17 : vector<8x8xf32>
    %19 = math.exp %18 : vector<8x8xf32>
    %cst_18 = arith.constant dense<0.000000e+00> : vector<8xf32>
    %20 = vector.multi_reduction <add>, %19, %cst_18 [1] : vector<8x8xf32> to vector<8xf32>
    %21 = vector.shape_cast %20 : vector<8xf32> to vector<8x1xf32>
    %22 = tpu.reciprocal %21 {approx = true} : vector<8x1xf32> -> vector<8x1xf32>
    %23 = arith.mulf %21, %22 : vector<8x1xf32>
    %cst_19 = arith.constant 2.000000e+00 : f32
    %24 = vector.broadcast %cst_19 : f32 to vector<8x1xf32>
    %25 = arith.subf %24, %23 : vector<8x1xf32>
    %26 = arith.mulf %22, %25 : vector<8x1xf32>
    %27 = vector.broadcast %26 : vector<8x1xf32> to vector<8x8xf32>
    %28 = arith.mulf %19, %27 : vector<8x8xf32>
    %cst_20 = arith.constant dense<0.000000e+00> : vector<8x32xf32>
    %29 = tpu.matmul %28, %5, %cst_20 {dimension_numbers = #tpu.dot_dimension_numbers<[1], [0], [0], [1], [0, 0, 1, 1], [], []>} : vector<8x8xf32>, vector<8x32xf32>, vector<8x32xf32> -> vector<8x32xf32>
    %c0_21 = arith.constant 0 : index
    %c0_22 = arith.constant 0 : index
    %c0_23 = arith.constant 0 : index
    %c0_24 = arith.constant 0 : index
    %30 = vector.load %arg8[%c0_21, %c0_22, %c0_23, %c0_24] : memref<1x1x8x8xf32, #tpu.memory_space<vmem>>, vector<1x1x8x8xf32>
    %31 = vector.shape_cast %30 : vector<1x1x8x8xf32> to vector<8x8xf32>
    %32 = vector.shape_cast %28 : vector<8x8xf32> to vector<1x1x8x8xf32>
    tpu.vector_store %arg8[%c0_21, %c0_22, %c0_23, %c0_24], %32 {strides = array<i32>} : memref<1x1x8x8xf32, #tpu.memory_space<vmem>>, vector<1x1x8x8xf32>,
    %c0_25 = arith.constant 0 : index
    %c0_26 = arith.constant 0 : index
    %c0_27 = arith.constant 0 : index
    %c0_28 = arith.constant 0 : index
    %33 = vector.load %arg7[%c0_25, %c0_26, %c0_27, %c0_28] : memref<1x1x8x32xf32, #tpu.memory_space<vmem>>, vector<1x1x8x32xf32>
    %34 = vector.shape_cast %33 : vector<1x1x8x32xf32> to vector<8x32xf32>
    %35 = vector.shape_cast %29 : vector<8x32xf32> to vector<1x1x8x32xf32>
    tpu.vector_store %arg7[%c0_25, %c0_26, %c0_27, %c0_28], %35 {strides = array<i32>} : memref<1x1x8x32xf32, #tpu.memory_space<vmem>>, vector<1x1x8x32xf32>,
    return
  }
  func.func @transform_0(%arg0: i32, %arg1: i32, %arg2: i32) -> (i32, i32, i32, i32) {
    %c0_i32 = arith.constant 0 : i32
    %c0_i32_0 = arith.constant 0 : i32
    return %arg0, %arg1, %arg2, %c0_i32 : i32, i32, i32, i32
  }
  func.func @transform_1(%arg0: i32, %arg1: i32, %arg2: i32) -> (i32, i32, i32, i32) {
    %c0_i32 = arith.constant 0 : i32
    %c0_i32_0 = arith.constant 0 : i32
    %c0_i32_1 = arith.constant 0 : i32
    return %arg0, %arg1, %c0_i32, %c0_i32_0 : i32, i32, i32, i32
  }
  func.func @transform_2(%arg0: i32, %arg1: i32, %arg2: i32) -> (i32, i32, i32, i32) {
    %c0_i32 = arith.constant 0 : i32
    %c0_i32_0 = arith.constant 0 : i32
    %c0_i32_1 = arith.constant 0 : i32
    return %arg0, %arg1, %c0_i32, %c0_i32_0 : i32, i32, i32, i32
  }
  func.func @transform_3(%arg0: i32, %arg1: i32, %arg2: i32) -> (i32, i32, i32, i32) {
    %c0_i32 = arith.constant 0 : i32
    %c0_i32_0 = arith.constant 0 : i32
    return %arg0, %arg1, %arg2, %c0_i32 : i32, i32, i32, i32
  }
  func.func @transform_4(%arg0: i32, %arg1: i32, %arg2: i32) -> (i32, i32, i32, i32) {
    %c0_i32 = arith.constant 0 : i32
    %c0_i32_0 = arith.constant 0 : i32
    return %arg0, %arg1, %arg2, %c0_i32 : i32, i32, i32, i32
  }
  func.func @transform_5(%arg0: i32, %arg1: i32, %arg2: i32) -> (i32, i32, i32, i32) {
    %c0_i32 = arith.constant 0 : i32
    %c0_i32_0 = arith.constant 0 : i32
    return %arg0, %arg1, %arg2, %c0_i32 : i32, i32, i32, i32
  }
}

</mosaic_0001>

<bundles_post_ra>
// kernel: tpu_custom_call.1
= control target key start
LH: loop header
LB: loop body
LE: loop exit
PB: predicated region body
PF: predicated region fallthrough
CT: control target
= control target key end

     0   :  { %s1497_s0 = inlined_call_operand.hbm [shape: f32[2,2,8,32], index: 0, kind: input, shape index: {}]   ;;  %s1498_s1 = inlined_call_operand.hbm [shape: f32[2,2,8,32], index: 1, kind: input, shape index: {}]   ;;  %s1499_s2 = inlined_call_operand.hbm [shape: f32[2,2,8,32], index: 2, kind: input, shape index: {}]   ;;  %s1500_s3 = inlined_call_operand.hbm [shape: s8[2,2,8,8], index: 3, kind: input, shape index: {}]   ;;  %s1501_s4 = inlined_call_operand.hbm [shape: f32[2,2,8,32], index: 4, kind: output, shape index: {0}]   ;;  %s1502_s5 = inlined_call_operand.hbm [shape: f32[2,2,8,8], index: 5, kind: output, shape index: {1}]  }
   0x1   :  { %1511 = sst [smem:[#allocation21_spill]] %s1497_s0 }
   0x2   :  { %1512 = sst [smem:[#allocation22_spill]] %s1498_s1 }
   0x3   :  { %1513 = sst [smem:[#allocation23_spill]] %s1499_s2 }
   0x4   :  { %11 = vsyncpa [#allocation3], 0 }
   0x5   :  { %13 = vsyncpa [#allocation3 + $0x1], 0 }
   0x6   :  { %14 = vsyncpa [#allocation6], 0 }
   0x7   :  { %15 = vsyncpa [#allocation9], 0 }
   0x8   :  { %17 = vsyncpa [#allocation9 + $0x1], 0 }
   0x9   :  { %18 = vsyncpa [#allocation4], 0 }
   0xa   :  { %20 = vsyncpa [#allocation4 + $0x1], 0 }
   0xb   :  { %21 = vsyncpa [#allocation12], 0 }
   0xc   :  { %23 = vsyncpa [#allocation12 + $0x1], 0  ;;  %s1210_s18 = smov 0   ;;  %s1212_s19 = smov 0  }
   0xd   :  { %s1214_s20 = smov 0   ;;  %s1216_s21 = smov 0  }
   0xe   :  { %s1218_s22 = smov 0   ;;  %s1220_s23 = smov 0  }
   0xf   :  { %s1222_s24 = smov 0   ;;  %s1224_s25 = smov 0  }
  0x10 LB: > { %s771_s26 = sadd.s32 4294967295, %s1169_s25   ;;  %s772_s27 = sadd.s32 4294967294, %s1169_s25   ;;  %s1169_s25 = sphi %s1224_s25, %s29_s25   ;;  %s1165_s24 = sphi %s1222_s24, %s1541_s24   ;;  %s1161_s23 = sphi %s1220_s23, %s1540_s23   ;;  %s1157_s22 = sphi %s1218_s22, %s1539_s22   ;;  %s1153_s21 = sphi %s1216_s21, %s1538_s21   ;;  %s1149_s20 = sphi %s1214_s20, %s1537_s20   ;;  %s1145_s19 = sphi %s1212_s19, %s1536_s19   ;;  %s1141_s18 = sphi %s1210_s18, %s1535_s18  }
  0x11   : > { %p1503_p0 = scmp.ne.s32.totalorder %s1149_s20, %s1145_s19  ;;  %p72_p1 = scmp.ne.s32.totalorder %s1145_s19, %s1141_s18 }
  0x12   : > { %p73_p2 = scmp.eq.s32.totalorder %s771_s26, 0  ;;  %p186_p3 = scmp.eq.s32.totalorder %s771_s26, 3 }
  0x13   : > { %p192_p4 = scmp.eq.s32.totalorder %s772_s27, 3  ;;  %p773_p5 = scmp.ge.s32.totalorder %s1169_s25, 1 }
  0x14   : > { %p1253_p6 = por %p73_p2, %p72_p1  ;;  %p1260_p7 = por %p186_p3, %p1503_p0 }
  0x15   : > { %p1264_p8 = por %p192_p4, %p72_p1  ;;  %p229_p9 = scmp.lt.s32.totalorder %s1169_s25, 5 }
  0x16   : > { %s1514_s28 = scalar_select %p1253_p6, 1, 0 }
  0x17   : > { %s1515_s29 = scalar_select %p1260_p7, 1, 0 }
  0x18   : > { %s1516_s30 = scalar_select %p1264_p8, 1, 0 }
  0x19   : > { %s774_s6 = sshll.u32 %s1157_s22, 1  ;;  %p1269_p10 = pnand %p773_p5, %p229_p9 }
  0x1a   : > { %1517 = sst [smem:[#allocation18_spill]] %s1516_s30  ;;  %s242_s8 = sadd.s32 %s1153_s21, %s774_s6 }
  0x1b   : > { %s1518_s7 = scalar_select %p1269_p10, 1, 0 }
  0x1c   : > { %s1273_s9 = sshll.u32 %s242_s8, 7  ;;  %s1171_s10 = smov [#allocation5]  }
  0x1d   : > { %s246_s11 = sshll.u32 %s1171_s10, 4  ;;  %p827_p11 = pneg %p1269_p10  ;;  %s247_s11 = int_to_ptr.vmem [resolvable:$true] %s246_s11 }
  0x1e   : > { %s1519_s1 = sld [smem:[#allocation22_spill]]  ;;  %s1172_s22 = smov [#allocation7]  }
  0x1f   : > { %p1283_p12 = pnand %p827_p11, %p1253_p6  ;;  %s1521_s2 = sld [smem:[#allocation23_spill]] }
  0x20   : > { %s261_s26 = sshll.u32 %s1172_s22, 4  ;;  %s262_s26 = int_to_ptr.vmem [resolvable:$true] %s261_s26 }
  0x21   : > { %p925_p1 = pneg %p1283_p12 }
  0x24   : > { %s244_s14 = scalar_lea.hbm %s1519_s1, %s1273_s9  ;;  %s928_s10 = scalar_lea.hbm %s1519_s1, 512 }
  0x25   : > { %s1291_s21 = scalar_lea.hbm %s1521_s2, %s1273_s9  ;;  %s923_s27 = scalar_lea.hbm %s244_s14, 128 }
  0x26   : > { %p924_p13 = scmp.ne.s32.totalorder %s244_s14, %s923_s27  ;;  %p929_p4 = scmp.lt.s32.totalorder %s244_s14, %s1519_s1 }
  0x27   : > { %p930_p5 = scmp.lt.s32.totalorder %s928_s10, %s923_s27 }
  0x28   : > { %p926_p2 = pnand %p925_p1, %p924_p13 }
  0x29   : > { %p931_p9 = por %p930_p5, %p929_p4 }
  0x2a   : > { %p927_p3 = pneg %p926_p2 }
  0x2c   : > { %p932_p11 = pnand %p931_p9, %p927_p3 }
  0x2e   : > { %935 = shalt.err (!%p932_p11)
}
  0x2f   : > { %s936_s16 = scalar_lea.vmem %s247_s11, 128  ;;  %p944_p2 = scmp.lt.s32.totalorder %s247_s11, %s247_s11 }
  0x30   : > { %p937_p0 = scmp.ne.s32.totalorder %s247_s11, %s936_s16  ;;  %p945_p7 = scmp.lt.s32.totalorder %s936_s16, %s936_s16 }
  0x32   : > { %p939_p8 = pnand %p937_p0, %p925_p1  ;;  %p946_p6 = por %p945_p7, %p944_p2 }
  0x34   : > { %p940_p13 = pneg %p939_p8 }
  0x36   : > { %p947_p10 = pnand %p946_p6, %p940_p13 }
  0x38   : > { %950 = shalt.err (!%p947_p10)
}
  0x39   : > { %830 = dma.hbm_to_vmem [thread:$0]  (!%p1283_p12), %s244_s14, 128, %s247_s11, [#allocation6]  }
  0x3a   : > { %s951_s17 = scalar_lea.hbm %s1291_s21, 128  ;;  %s956_s6 = scalar_lea.hbm %s1521_s2, 512 }
  0x3b   : > { %p952_p3 = scmp.ne.s32.totalorder %s1291_s21, %s951_s17  ;;  %p957_p6 = scmp.lt.s32.totalorder %s1291_s21, %s1521_s2 }
  0x3c   : > { %p958_p7 = scmp.lt.s32.totalorder %s956_s6, %s951_s17 }
  0x3d   : > { %p954_p4 = pnand %p952_p3, %p925_p1 }
  0x3e   : > { %p959_p8 = por %p958_p7, %p957_p6 }
  0x3f   : > { %p955_p0 = pneg %p954_p4 }
  0x41   : > { %p960_p10 = pnand %p959_p8, %p955_p0 }
  0x43   : > { %963 = shalt.err (!%p960_p10)
}
  0x44   : > { %s964_s11 = scalar_lea.vmem %s262_s26, 128  ;;  %p972_p13 = scmp.lt.s32.totalorder %s262_s26, %s262_s26 }
  0x45   : > { %p965_p5 = scmp.ne.s32.totalorder %s262_s26, %s964_s11  ;;  %p973_p2 = scmp.lt.s32.totalorder %s964_s11, %s964_s11 }
  0x47   : > { %p967_p9 = pnand %p965_p5, %p925_p1  ;;  %p974_p3 = por %p973_p2, %p972_p13 }
  0x49   : > { %p968_p11 = pneg %p967_p9 }
  0x4b   : > { %p975_p4 = pnand %p974_p3, %p968_p11 }
  0x4d   : > { %978 = shalt.err (!%p975_p4)
}
  0x4e   : > { %833 = dma.hbm_to_vmem [thread:$0]  (!%p1283_p12), %s1291_s21, 128, %s262_s26, [#allocation6]  }
  0x4f   : > { %s44_s14 = sadd.s32 1, %s1161_s23  ;;  %s48_s12 = sadd.s32 1, %s1165_s24 }
  0x50   : > { %p46_p1 = scmp.ge.s32.totalorder %s44_s14, 2  ;;  %s59_s13 = sadd.s32 1, %s1149_s20 }
  0x51   : > { %p67_p0 = scmp.eq.s32.totalorder %s1169_s25, 0  ;;  %p848_p6 = scmp.lt.s32.totalorder %s1169_s25, 4 }
  0x52   : > { %s1543_s14 = smov (%p46_p1, %s44_s14), 0  ;;  %s1545_s12 = smov (!%p46_p1, %s48_s12), %s1165_s24 }
  0x53   : > { %1522 = sst [smem:[#allocation19_spill]] %s1543_s14  ;;  %s53_s15 = ssub.s32 %s1161_s23, %s1543_s14 }
  0x54   : > { %p1523_p7 = scmp.ne.s32.totalorder %s1149_s20, %s1145_s19  ;;  %p50_p12 = scmp.ge.s32.totalorder %s1545_s12, 2 }
  0x55   : > { %s1345_s21 = sand.u32 1, %s1149_s20   ;;  %s780_s17 = sshll.u32 %s1165_s24, 1 }
  0x56   : > { %p1340_p8 = por %p67_p0, %p1523_p7  ;;  %s779_s26 = sshll.u32 %s1345_s21, 3 }
  0x57   : > { %s1547_s12 = smov (%p50_p12, %s1545_s12), 0  ;;  %s1354_s27 = sadd.s32 %s1161_s23, %s780_s17 }
  0x58   : > { %1525 = sst [smem:[#allocation20_spill]] %s1547_s12  ;;  %s52_s22 = ssub.s32 %s1165_s24, %s1547_s12 }
  0x59   : > { %s54_s6 = sor.u32 %s53_s15, %s52_s22  ;;  %s781_s8 = sshll.u32 %s1354_s27, 7 }
  0x5a   : > { %p57_p10 = scmp.eq.s32.totalorder %s54_s6, 0  ;;  %s1526_s0 = sld [smem:[#allocation21_spill]] }
  0x5b   : > { %s276_s2 = scalar_lea.vmem [#allocation2], %s779_s26  ;;  %p1364_p5 = pnand %p848_p6, %p1340_p8 }
  0x5c   : > { %s286_s14 = sshll.u32 %s276_s2, 4  ;;  %s273_s15 = scalar_lea.sflag [#allocation3], %s1345_s21  ;;  %s287_s14 = int_to_ptr.vmem [resolvable:$true] %s286_s14 }
  0x5d   : > { %s1369_s17 = scalar_select %p57_p10, %s1149_s20, %s59_s13  }
  0x5e   : > { %p981_p9 = pneg %p1364_p5  ;;  %s992_s22 = scalar_lea.vmem %s287_s14, 128 }
  0x5f   : > { %p993_p11 = scmp.ne.s32.totalorder %s287_s14, %s992_s22  ;;  %s1173_s2 = smov [#allocation2]  }
  0x60   : > { %s284_s1 = scalar_lea.hbm %s1526_s0, %s781_s8  ;;  %s997_s16 = sshll.u32 %s1173_s2, 4  ;;  %s998_s16 = int_to_ptr.vmem [resolvable:$false] %s997_s16 }
  0x61   : > { %p995_p13 = pnand %p993_p11, %p981_p9  ;;  %s999_s26 = scalar_lea.vmem %s998_s16, 256 }
  0x62   : > { %p1000_p3 = scmp.lt.s32.totalorder %s287_s14, %s998_s16  ;;  %p1001_p4 = scmp.lt.s32.totalorder %s999_s26, %s992_s22 }
  0x63   : > { %p996_p2 = pneg %p995_p13 }
  0x64   : > { %p1002_p1 = por %p1001_p4, %p1000_p3 }
  0x66   : > { %p1003_p0 = pnand %p1002_p1, %p996_p2 }
  0x68   : > { %1006 = shalt.err (!%p1003_p0)
}
  0x69   : > { %837 = dma.hbm_to_vmem [thread:$0]  (!%p1364_p5), %s284_s1, 128, %s287_s14, %s273_s15  }
  0x6a   : > { %s782_s13 = sshll.u32 %s1345_s21, 1  ;;  %s784_s6 = sshll.u32 %s1354_s27, 5 }
  0x6b   : > { %s305_s11 = scalar_lea.hbm %s1500_s3, %s784_s6  ;;  %s297_s2 = scalar_lea.vmem [#allocation8], %s782_s13 }
  0x6c   : > { %s307_s0 = sshll.u32 %s297_s2, 4  ;;  %s294_s22 = scalar_lea.sflag [#allocation9], %s1345_s21  ;;  %s308_s0 = int_to_ptr.vmem [resolvable:$true] %s307_s0 }
  0x6d   : > { %s1020_s16 = scalar_lea.vmem %s308_s0, 32  ;;  %s1174_s26 = smov [#allocation8]  }
  0x6e   : > { %p1021_p6 = scmp.ne.s32.totalorder %s308_s0, %s1020_s16  ;;  %s1025_s12 = sshll.u32 %s1174_s26, 4  ;;  %s1026_s12 = int_to_ptr.vmem [resolvable:$false] %s1025_s12 }
  0x6f   : > { %s1027_s1 = scalar_lea.vmem %s1026_s12, 64  ;;  %p1028_p12 = scmp.lt.s32.totalorder %s308_s0, %s1026_s12 }
  0x70   : > { %p1023_p7 = pnand %p1021_p6, %p981_p9  ;;  %p1029_p10 = scmp.lt.s32.totalorder %s1027_s1, %s1020_s16 }
  0x72   : > { %p1024_p8 = pneg %p1023_p7  ;;  %p1030_p11 = por %p1029_p10, %p1028_p12 }
  0x74   : > { %p1031_p13 = pnand %p1030_p11, %p1024_p8 }
  0x76   : > { %1034 = shalt.err (!%p1031_p13)
}
  0x77   : > { %840 = dma.hbm_to_vmem [thread:$0]  (!%p1364_p5), %s305_s11, 32, %s308_s0, %s294_s22  }
  0x78   : > { %p1528_p2 = scmp.ne.s32.totalorder %s1518_s7, 0 }
  0x79   : > { %s1393_s14 = sand.u32 (!%p1528_p2), 1, %s1145_s19   ;;  %p1529_p9 = scmp.ne.s32.totalorder (!%p1528_p2), %s1514_s28, 0 }
  0x7a   : > { %316 = sbr.rel (%p1528_p2) target bundleno = 860 (0x35c), region = 36  ;;  %s1396_s21 = sshll.u32 (!%p1528_p2), %s1393_s14, 3 }
  0x7b   : > { %s319_s12 = scalar_lea.sflag (!%p1528_p2), [#allocation3], %s1393_s14  ;;  %s322_s27 = scalar_lea.vmem (!%p1528_p2), [#allocation2], %s1396_s21 }
  0x7f   : > { %1120 = dma.done.wait (%p1529_p9), %s319_s12, 128  }
  0x80   : > { %1122 = vsyncadd (%p1529_p9), %s319_s12, 4294967168 }
  0x81   : > { %1124 = dma.done.wait (%p1529_p9), [#allocation6], 256  }
  0x82   : > { %1126 = vsyncadd (%p1529_p9), [#allocation6], 4294967040  ;;  %s787_s0 = sshll.u32 %s1393_s14, 1  ;;  %s336_s30 = scalar_lea.sflag [#allocation9], %s1393_s14 }
  0x83   : > { %s339_s7 = scalar_lea.vmem [#allocation8], %s787_s0 }
  0x84   : > { %1128 = dma.done.wait (%p1529_p9), %s336_s30, 32  }
  0x85   : > { %1130 = vsyncadd (%p1529_p9), %s336_s30, 4294967264  ;;  %v1175_v0 = vmov 0.0   ;;  %vm1176_vm0 = vmmov 0   ;;  %vm381_vm1 = vcmask 261120   ;;  %v379_v1 = vld [vmem:[#allocation5] sm:$0xff]  ;;  %v378_v2 = vld [vmem:[%s322_s27] sm:$0xff]  ;;  %s591_s8 = scalar_lea.hbm %s1502_s5, %s1273_s9 }
  0x86   : > { %805 = vmatprep.subr.mxu0 %v1175_v0  ;;  %807 = vmatprep.mubr.msk.f32.mxu0 %vm1176_vm0, %v1175_v0  ;;  %v459_v3 = vld [vmem:[%s339_s7] sm:$0x3]  ;;  %v1177_v4 = vmov 0   ;;  %vm465_vm4 = vcmask 64512   ;;  %v380_v17 = vld [vmem:[#allocation7] sm:$0xff]  ;;  %s375_s28 = scalar_lea.vmem [#allocation11], %s1396_s21 }
  0x87   : > { %810 = vmatprep.subr.mxu1 %v1175_v0  ;;  %812 = vmatprep.mubr.msk.f32.mxu1 %vm1176_vm0, %v1175_v0  ;;  %vm460_vm2 = vnez %v459_v3  ;;  %s593_s15 = sshll.u32 %s375_s28, 4  ;;  %s561_s10 = scalar_lea.sflag [#allocation12], %s1393_s14  ;;  %s594_s15 = int_to_ptr.vmem [resolvable:$true] %s593_s15 }
  0x88   : > { %806 = vmatpush3.xpose.msk.msra.mxu0 %vm381_vm1, %v379_v1  ;;  %v461_v5 = vsel %vm460_vm2, 16843009, %v1177_v4  ;;  %811 = vmatpush3.msra.mxu1 %v380_v17  ;;  %s1035_s11 = scalar_lea.vmem %s594_s15, 128  ;;  %p1530_p3 = scmp.ne.s32.totalorder %s1515_s29, 0 }
  0x89   : > { %v462_v6 = vunpack.c.0.s8 %v461_v5  ;;  %p1036_p5 = scmp.ne.s32.totalorder %s594_s15, %s1035_s11  ;;  %s1178_s2 = smov [#allocation11]  }
  0x8a   : > { %s1039_s22 = sshll.u32 %s1178_s2, 4  ;;  %s1040_s22 = int_to_ptr.vmem [resolvable:$false] %s1039_s22 }
  0x8b   : > { %808 = vmatmul.mubr.msk.f32.vlgmr.msra.gmra.mxu0 %vm381_vm1, %v378_v2  ;;  %vm463_vm3 = vcmp.ne.s32.totalorder %v462_v6, 0  ;;  %p1037_p4 = pnand %p1036_p5, %p1530_p3  ;;  %s1041_s16 = scalar_lea.vmem %s1040_s22, 256 }
  0x8c   : > { %p1042_p0 = scmp.lt.s32.totalorder %s594_s15, %s1040_s22  ;;  %p1043_p6 = scmp.lt.s32.totalorder %s1041_s16, %s1035_s11 }
  0x8d   : > { %p1038_p1 = pneg %p1037_p4 }
  0x8e   : > { %p1044_p7 = por %p1043_p6, %p1042_p0 }
  0x90   : > { %p1045_p8 = pnand %p1044_p7, %p1038_p1 }
 0x14b   : > { %v454_v7 = vpop.f32.mrf.mxu0 }
 0x14c   : > { %v458_v8 = vmul.f32 0.17677669, %v454_v7 }
 0x14d   : > { %v809_v9 = vpop.f32.mrf.mxu0 }
 0x14e   : > { %v464_v10 = vsel %vm463_vm3, -1e+09, %v458_v8 }
 0x14f   : > { %v466_v11 = vsel %vm465_vm4, %v464_v10, -inf }
 0x150   : > { %467 = vmax.xlane.f32.xlu0 %v466_v11 }
 0x1d9   : > { %v468_v12 = vpop.xlane.xlu0 %467 }
 0x1da   : > { %v469_v13 = vsub.f32 %v464_v10, %v468_v12 }
 0x1dc   : > { %v470_v14 = vmul.f32 1.442695, %v469_v13 }
 0x1de   : > { %919 = vpow2.f32 %v470_v14 }
 0x1eb   : > { %v920_v15 = vpop.eup %919 }
 0x1ec   : > { %v472_v16 = vsel %vm465_vm4, %v920_v15, 0.0 }
 0x1ed   : > { %473 = vadd.xlane.f32.xlu0 %v472_v16 }
 0x276   : > { %v474_v18 = vpop.xlane.xlu0 %473 }
 0x277   : > { %921 = vrcp.f32 %v474_v18 }
 0x284   : > { %v922_v19 = vpop.eup %921 }
 0x285   : > { %v476_v20 = vmul.f32 %v922_v19, %v474_v18 }
 0x287   : > { %v477_v21 = vsub.f32 2.0, %v476_v20 }
 0x289   : > { %v478_v22 = vmul.f32 %v922_v19, %v477_v21 }
 0x28b   : > { %v479_v23 = vmul.f32 %v920_v15, %v478_v22 }
 0x28d   : > { %813 = vmatmul.mubr.msk.f32.vlgmr.msra.gmra.mxu1 %vm465_vm4, %v479_v23  ;;  %553 = vst.msk [vmem:[%s375_s28] sm:$0xff] %vm465_vm4, %v479_v23 }
 0x28e   : > { %1048 = shalt.err (!%p1045_p8)
}
 0x28f   : > { %s1049_s26 = scalar_lea.hbm %s591_s8, 128  ;;  %s1053_s27 = scalar_lea.hbm %s1502_s5, 512 }
 0x290   : > { %p1050_p12 = scmp.ne.s32.totalorder %s591_s8, %s1049_s26  ;;  %p1054_p13 = scmp.lt.s32.totalorder %s591_s8, %s1502_s5 }
 0x291   : > { %p1055_p2 = scmp.lt.s32.totalorder %s1053_s27, %s1049_s26 }
 0x292   : > { %p1051_p10 = pnand %p1050_p12, %p1530_p3 }
 0x293   : > { %p1056_p9 = por %p1055_p2, %p1054_p13 }
 0x294   : > { %p1052_p11 = pneg %p1051_p10 }
 0x296   : > { %p1057_p5 = pnand %p1056_p9, %p1052_p11 }
 0x298   : > { %1060 = shalt.err (!%p1057_p5)
}
 0x299   : > { %824 = dma.vmem_to_hbm [thread:$0]  (%p1530_p3), %s594_s15, 128, %s591_s8, %s561_s10  }
 0x29a   : > { %s368_s7 = scalar_lea.vmem [#allocation10], %s1396_s21  ;;  %s1443_s11 = scalar_lea.hbm %s1501_s4, %s1273_s9 }
 0x29b   : > { %s577_s28 = sshll.u32 %s368_s7, 4  ;;  %s556_s2 = scalar_lea.sflag [#allocation4], %s1393_s14  ;;  %s1445_s28 = int_to_ptr.vmem [resolvable:$true] %s577_s28 }
 0x29c   : > { %s1061_s22 = scalar_lea.vmem %s1445_s28, 128  ;;  %s1179_s21 = smov [#allocation10]  }
 0x29d   : > { %p1062_p4 = scmp.ne.s32.totalorder %s1445_s28, %s1061_s22  ;;  %s1065_s15 = sshll.u32 %s1179_s21, 4  ;;  %s1066_s15 = int_to_ptr.vmem [resolvable:$false] %s1065_s15 }
 0x29e   : > { %s1067_s9 = scalar_lea.vmem %s1066_s15, 256  ;;  %p1068_p6 = scmp.lt.s32.totalorder %s1445_s28, %s1066_s15 }
 0x29f   : > { %p1063_p1 = pnand %p1062_p4, %p1530_p3  ;;  %p1069_p7 = scmp.lt.s32.totalorder %s1067_s9, %s1061_s22 }
 0x2a1   : > { %p1064_p0 = pneg %p1063_p1  ;;  %p1070_p8 = por %p1069_p7, %p1068_p6 }
 0x2a3   : > { %p1071_p12 = pnand %p1070_p8, %p1064_p0 }
 0x34d   : > { %v549_v24 = vpop.f32.mrf.mxu1 }
 0x34e   : > { %554 = vst.msk [vmem:[%s368_s7] sm:$0xff] %vm381_vm1, %v549_v24 }
 0x34f   : > { %v814_v25 = vpop.f32.mrf.mxu1 }
 0x350   : > { %1074 = shalt.err (!%p1071_p12)
}
 0x351   : > { %s1075_s8 = scalar_lea.hbm %s1443_s11, 128  ;;  %s1079_s16 = scalar_lea.hbm %s1501_s4, 512 }
 0x352   : > { %p1076_p10 = scmp.ne.s32.totalorder %s1443_s11, %s1075_s8  ;;  %p1080_p2 = scmp.lt.s32.totalorder %s1443_s11, %s1501_s4 }
 0x353   : > { %p1081_p9 = scmp.lt.s32.totalorder %s1079_s16, %s1075_s8 }
 0x354   : > { %p1077_p11 = pnand %p1076_p10, %p1530_p3 }
 0x355   : > { %p1082_p5 = por %p1081_p9, %p1080_p2 }
 0x356   : > { %p1078_p13 = pneg %p1077_p11 }
 0x358   : > { %p1083_p4 = pnand %p1082_p5, %p1078_p13 }
 0x35a   : > { %1086 = shalt.err (!%p1083_p4)
}
 0x35b   : > { %823 = dma.vmem_to_hbm [thread:$0]  (%p1530_p3), %s1445_s28, 128, %s1443_s11, %s556_s2  }
 0x35c PF: > { %s1531_s12 = sld [smem:[#allocation18_spill]]  ;;  %p849_p1 = scmp.ge.s32.totalorder %s1169_s25, 2 }
 0x35d   : > { %s605_s27 = sand.u32 1, %s1141_s18  }
 0x35e   : > { %s606_s0 = scalar_lea.sflag [#allocation4], %s605_s27 }
 0x362   : > { %p1532_p0 = scmp.ne.s32.totalorder %s1531_s12, 0 }
 0x364   : > { %p842_p6 = pnand %p849_p1, %p1532_p0 }
 0x366   : > { %p843_p7 = pneg %p842_p6 }
 0x368   : > { %1132 = dma.done.wait (%p843_p7), %s606_s0, 128  }
 0x369   : > { %1134 = vsyncadd (%p843_p7), %s606_s0, 4294967168  ;;  %s615_s30 = scalar_lea.sflag [#allocation12], %s605_s27 }
 0x36a   : > { %1136 = dma.done.wait (%p843_p7), %s615_s30, 128  }
 0x36b   : > { %1138 = vsyncadd (%p843_p7), %s615_s30, 4294967168  ;;  %s29_s25 = sadd.s32 1, %s1169_s25   ;;  %s1533_s29 = sld [smem:[#allocation19_spill]] }
 0x36c   : > { %p26_p8 = scmp.ge.s32.totalorder %s29_s25, 6   ;;  %s1534_s7 = sld [smem:[#allocation20_spill]] }
 0x36d   : > { %s1535_s18 = smov %s1145_s19  ;;  %s1536_s19 = smov %s1149_s20 }
 0x36e   : > { %s1537_s20 = smov %s1369_s17  ;;  %s1538_s21 = smov %s1161_s23 }
 0x36f   : > { %s1539_s22 = smov %s1165_s24  ;;  %28 = sbr.rel (!%p26_p8) target bundleno = 16 (0x10), region = 121 }
 0x371   : > { %s1540_s23 = smov %s1533_s29 }
 0x372   : > { %s1541_s24 = smov %s1534_s7 }
 0x374   :  { %620 = vsyncpa [#allocation3], 1 }
 0x375   :  { %622 = vsyncpa [#allocation3 + $0x1], 1 }
 0x376   :  { %623 = vsyncpa [#allocation6], 1 }
 0x377   :  { %624 = vsyncpa [#allocation9], 1 }
 0x378   :  { %626 = vsyncpa [#allocation9 + $0x1], 1 }
 0x379   :  { %627 = vsyncpa [#allocation4], 1 }
 0x37a   :  { %629 = vsyncpa [#allocation4 + $0x1], 1 }
 0x37b   :  { %630 = vsyncpa [#allocation12], 1 }
 0x37c   :  { %632 = vsyncpa [#allocation12 + $0x1], 1 }

// kernel: tpu_custom_call.1
= control target key start
LH: loop header
LB: loop body
LE: loop exit
PB: predicated region body
PF: predicated region fallthrough
CT: control target
= control target key end

     0   :  { %s1548_s0 = inlined_call_operand.hbm [shape: f32[2,2,8,32], index: 0, kind: input, shape index: {}]   ;;  %s1549_s1 = inlined_call_operand.hbm [shape: f32[2,2,8,32], index: 1, kind: input, shape index: {}]   ;;  %s1550_s2 = inlined_call_operand.hbm [shape: f32[2,2,8,32], index: 2, kind: input, shape index: {}]   ;;  %s1551_s3 = inlined_call_operand.hbm [shape: s8[2,2,8,8], index: 3, kind: input, shape index: {}]   ;;  %s1552_s4 = inlined_call_operand.hbm [shape: f32[2,2,8,32], index: 4, kind: output, shape index: {0}]   ;;  %s1553_s5 = inlined_call_operand.hbm [shape: f32[2,2,8,8], index: 5, kind: output, shape index: {1}]  }
   0x1   :  { %1563 = sst [smem:[#allocation27_spill]] %s1549_s1 }
   0x2   :  { %11 = vsyncpa [#allocation3], 0 }
   0x3   :  { %13 = vsyncpa [#allocation3 + $0x1], 0 }
   0x4   :  { %14 = vsyncpa [#allocation6], 0 }
   0x5   :  { %16 = vsyncpa [#allocation6 + $0x1], 0 }
   0x6   :  { %17 = vsyncpa [#allocation9], 0 }
   0x7   :  { %19 = vsyncpa [#allocation9 + $0x1], 0 }
   0x8   :  { %20 = vsyncpa [#allocation4], 0 }
   0x9   :  { %22 = vsyncpa [#allocation4 + $0x1], 0 }
   0xa   :  { %23 = vsyncpa [#allocation12], 0 }
   0xb   :  { %25 = vsyncpa [#allocation12 + $0x1], 0  ;;  %s1263_s18 = smov 0   ;;  %s1265_s19 = smov 0  }
   0xc   :  { %s1267_s20 = smov 0   ;;  %s1269_s21 = smov 0  }
   0xd   :  { %s1271_s22 = smov 0   ;;  %s1273_s23 = smov 0  }
   0xe   :  { %s1275_s24 = smov 0   ;;  %s1277_s25 = smov 0  }
   0xf LB: > { %1564 = sst [smem:[#allocation18_spill]] %s1194_s18  ;;  %s1304_s26 = sadd.s32 4294967295, %s1222_s25   ;;  %s1222_s25 = sphi %s1277_s25, %s31_s25   ;;  %s1218_s24 = sphi %s1275_s24, %s1588_s24   ;;  %s1214_s23 = sphi %s1273_s23, %s1587_s23   ;;  %s1210_s22 = sphi %s1271_s22, %s1586_s22   ;;  %s1206_s21 = sphi %s1269_s21, %s1585_s21   ;;  %s1202_s20 = sphi %s1267_s20, %s1584_s20   ;;  %s1198_s19 = sphi %s1265_s19, %s1590_s19   ;;  %s1194_s18 = sphi %s1263_s18, %s1589_s18  }
  0x10   : > { %1565 = sst [smem:[#allocation19_spill]] %s1202_s20  ;;  %s824_s27 = sadd.s32 4294967294, %s1222_s25  }
  0x11   : > { %1566 = sst [smem:[#allocation20_spill]] %s1214_s23  ;;  %s46_s28 = sadd.s32 1, %s1214_s23 }
  0x12   : > { %1567 = sst [smem:[#allocation21_spill]] %s1218_s24  ;;  %s50_s29 = sadd.s32 1, %s1218_s24 }
  0x13   : > { %1568 = sst [smem:[#allocation22_spill]] %s1222_s25  ;;  %p48_p0 = scmp.ge.s32.totalorder %s46_s28, 2 }
  0x14   : > { %s61_s30 = sadd.s32 1, %s1202_s20  ;;  %p68_p1 = scmp.ne.s32.totalorder %s1202_s20, %s1198_s19 }
  0x15   : > { %p69_p2 = scmp.eq.s32.totalorder %s1222_s25, 0  ;;  %s1592_s28 = smov (%p48_p0, %s46_s28), 0 }
  0x16   : > { %1569 = sst [smem:[#allocation23_spill]] %s1592_s28  ;;  %s1594_s29 = smov (!%p48_p0, %s50_s29), %s1218_s24 }
  0x17   : > { %s55_s6 = ssub.s32 %s1214_s23, %s1592_s28  ;;  %p1318_p3 = por %p69_p2, %p68_p1 }
  0x18   : > { %p52_p4 = scmp.ge.s32.totalorder %s1594_s29, 2  ;;  %p74_p5 = scmp.ne.s32.totalorder %s1198_s19, %s1194_s18 }
  0x19   : > { %p75_p6 = scmp.eq.s32.totalorder %s1304_s26, 0  ;;  %p188_p7 = scmp.eq.s32.totalorder %s1304_s26, 3 }
  0x1a   : > { %s1596_s29 = smov (%p52_p4, %s1594_s29), 0  ;;  %p194_p10 = scmp.eq.s32.totalorder %s824_s27, 3 }
  0x1b   : > { %1571 = sst [smem:[#allocation24_spill]] %s1596_s29  ;;  %p1328_p8 = por %p75_p6, %p74_p5 }
  0x1c   : > { %p1332_p9 = por %p188_p7, %p68_p1  ;;  %s54_s10 = ssub.s32 %s1218_s24, %s1596_s29 }
  0x1d   : > { %s56_s11 = sor.u32 %s55_s6, %s54_s10  ;;  %p1338_p12 = por %p194_p10, %p74_p5 }
  0x1e   : > { %p59_p11 = scmp.eq.s32.totalorder %s56_s11, 0  ;;  %p903_p13 = scmp.lt.s32.totalorder %s1222_s25, 4 }
  0x1f   : > { %s1574_s12 = scalar_select %p1338_p12, 1, 0 }
  0x20   : > { %s1344_s13 = sand.u32 1, %s1202_s20   ;;  %s828_s16 = sshll.u32 %s1218_s24, 1 }
  0x21   : > { %1575 = sst [smem:[#allocation25_spill]] %s1574_s12  ;;  %s1350_s15 = sshll.u32 %s1344_s13, 3 }
  0x22   : > { %s1347_s14 = scalar_select %p59_p11, %s1202_s20, %s61_s30  }
  0x23   : > { %s1354_s17 = sadd.s32 %s1214_s23, %s828_s16  ;;  %p1358_p0 = pnand %p903_p13, %p1318_p3 }
  0x24   : > { %1576 = sst [smem:[#allocation26_spill]] %s1347_s14  ;;  %s1363_s6 = sshll.u32 %s1354_s17, 7 }
  0x25   : > { %s265_s10 = sand.u32 1, %s1222_s25   ;;  %s1578_s1 = sld [smem:[#allocation27_spill]] }
  0x26   : > { %s269_s28 = scalar_lea.vmem [#allocation5], %s1350_s15  ;;  %p839_p1 = scmp.ge.s32.totalorder %s1222_s25, 1 }
  0x27   : > { %s278_s24 = sshll.u32 %s269_s28, 4  ;;  %p324_p2 = scmp.lt.s32.totalorder %s1222_s25, 5  ;;  %s279_s24 = int_to_ptr.vmem [resolvable:$true] %s278_s24 }
  0x28   : > { %s1373_s7 = scalar_lea.sflag [#allocation6], %s265_s10  ;;  %p978_p3 = pneg %p1358_p0 }
  0x29   : > { %s989_s16 = scalar_lea.vmem %s279_s24, 128  ;;  %s1224_s23 = smov [#allocation5]  }
  0x2a   : > { %p990_p4 = scmp.ne.s32.totalorder %s279_s24, %s989_s16  ;;  %s994_s14 = sshll.u32 %s1224_s23, 4  ;;  %s995_s14 = int_to_ptr.vmem [resolvable:$false] %s994_s14 }
  0x2b   : > { %s276_s29 = scalar_lea.hbm %s1578_s1, %s1363_s6  ;;  %s996_s30 = scalar_lea.vmem %s995_s14, 256 }
  0x2c   : > { %p992_p5 = pnand %p990_p4, %p978_p3  ;;  %p997_p7 = scmp.lt.s32.totalorder %s279_s24, %s995_s14 }
  0x2d   : > { %p998_p10 = scmp.lt.s32.totalorder %s996_s30, %s989_s16 }
  0x2e   : > { %p993_p6 = pneg %p992_p5 }
  0x2f   : > { %p999_p11 = por %p998_p10, %p997_p7 }
  0x31   : > { %p1000_p13 = pnand %p999_p11, %p993_p6 }
  0x33   : > { %1003 = shalt.err (!%p1000_p13)
}
  0x34   : > { %889 = dma.hbm_to_vmem [thread:$0]  (!%p1358_p0), %s276_s29, 128, %s279_s24, %s1373_s7  }
  0x35   : > { %p1387_p4 = pnand %p839_p1, %p324_p2  ;;  %s256_s10 = scalar_lea.hbm %s1548_s0, %s1363_s6 }
  0x36   : > { %s248_s11 = scalar_lea.vmem [#allocation2], %s1350_s15  ;;  %s296_s20 = scalar_lea.hbm %s1550_s2, %s1363_s6 }
  0x37   : > { %s258_s16 = sshll.u32 %s248_s11, 4  ;;  %s245_s12 = scalar_lea.sflag [#allocation3], %s1344_s13  ;;  %s259_s16 = int_to_ptr.vmem [resolvable:$true] %s258_s16 }
  0x38   : > { %s1017_s18 = scalar_lea.vmem %s259_s16, 128  ;;  %s1225_s24 = smov [#allocation2]  }
  0x39   : > { %p1018_p5 = scmp.ne.s32.totalorder %s259_s16, %s1017_s18  ;;  %s1022_s29 = sshll.u32 %s1225_s24, 4  ;;  %s1023_s29 = int_to_ptr.vmem [resolvable:$false] %s1022_s29 }
  0x3a   : > { %s1024_s25 = scalar_lea.vmem %s1023_s29, 256  ;;  %p1025_p6 = scmp.lt.s32.totalorder %s259_s16, %s1023_s29 }
  0x3b   : > { %p1020_p1 = pnand %p1018_p5, %p978_p3  ;;  %p1026_p7 = scmp.lt.s32.totalorder %s1024_s25, %s1017_s18 }
  0x3d   : > { %p1021_p2 = pneg %p1020_p1  ;;  %p1027_p10 = por %p1026_p7, %p1025_p6 }
  0x3f   : > { %p1028_p11 = pnand %p1027_p10, %p1021_p2 }
  0x41   : > { %1031 = shalt.err (!%p1028_p11)
}
  0x42   : > { %886 = dma.hbm_to_vmem [thread:$0]  (!%p1358_p0), %s256_s10, 128, %s259_s16, %s245_s12  }
  0x43   : > { %s289_s1 = scalar_lea.vmem [#allocation7], %s1350_s15  ;;  %s836_s14 = sshll.u32 %s1344_s13, 1 }
  0x44   : > { %s298_s28 = sshll.u32 %s289_s1, 4  ;;  %s1226_s18 = smov [#allocation7]   ;;  %s299_s28 = int_to_ptr.vmem [resolvable:$true] %s298_s28 }
  0x45   : > { %s1045_s11 = scalar_lea.vmem %s299_s28, 128  ;;  %s1050_s25 = sshll.u32 %s1226_s18, 4  ;;  %s1051_s25 = int_to_ptr.vmem [resolvable:$false] %s1050_s25 }
  0x46   : > { %p1046_p13 = scmp.ne.s32.totalorder %s299_s28, %s1045_s11  ;;  %s1052_s30 = scalar_lea.vmem %s1051_s25, 256 }
  0x47   : > { %p1053_p2 = scmp.lt.s32.totalorder %s299_s28, %s1051_s25  ;;  %p1054_p6 = scmp.lt.s32.totalorder %s1052_s30, %s1045_s11 }
  0x48   : > { %p1048_p5 = pnand %p1046_p13, %p978_p3 }
  0x49   : > { %p1055_p7 = por %p1054_p6, %p1053_p2 }
  0x4a   : > { %p1049_p1 = pneg %p1048_p5 }
  0x4c   : > { %p1056_p10 = pnand %p1055_p7, %p1049_p1 }
  0x4e   : > { %1059 = shalt.err (!%p1056_p10)
}
  0x4f   : > { %892 = dma.hbm_to_vmem [thread:$0]  (!%p1358_p0), %s296_s20, 128, %s299_s28, %s1373_s7  }
  0x50   : > { %s838_s10 = sshll.u32 %s1354_s17, 5  ;;  %s309_s1 = scalar_lea.vmem [#allocation8], %s836_s14 }
  0x51   : > { %s317_s29 = scalar_lea.hbm %s1551_s3, %s838_s10  ;;  %s319_s11 = sshll.u32 %s309_s1, 4  ;;  %s320_s11 = int_to_ptr.vmem [resolvable:$true] %s319_s11 }
  0x52   : > { %s306_s18 = scalar_lea.sflag [#allocation9], %s1344_s13  ;;  %s1073_s25 = scalar_lea.vmem %s320_s11, 32 }
  0x53   : > { %p1074_p11 = scmp.ne.s32.totalorder %s320_s11, %s1073_s25  ;;  %s1227_s6 = smov [#allocation8]  }
  0x54   : > { %s1078_s30 = sshll.u32 %s1227_s6, 4  ;;  %s1079_s30 = int_to_ptr.vmem [resolvable:$false] %s1078_s30 }
  0x55   : > { %p1076_p13 = pnand %p1074_p11, %p978_p3  ;;  %s1080_s12 = scalar_lea.vmem %s1079_s30, 64 }
  0x56   : > { %p1081_p1 = scmp.lt.s32.totalorder %s320_s11, %s1079_s30  ;;  %p1082_p2 = scmp.lt.s32.totalorder %s1080_s12, %s1073_s25 }
  0x57   : > { %p1077_p5 = pneg %p1076_p13 }
  0x58   : > { %p1083_p6 = por %p1082_p2, %p1081_p1 }
  0x5a   : > { %p1084_p7 = pnand %p1083_p6, %p1077_p5 }
  0x5c   : > { %1087 = shalt.err (!%p1084_p7)
}
  0x5d   : > { %895 = dma.hbm_to_vmem [thread:$0]  (!%p1358_p0), %s317_s29, 32, %s320_s11, %s306_s18  }
  0x5e   : > { %328 = sbr.rel (%p1387_p4) target bundleno = 833 (0x341), region = 36  ;;  %s1432_s20 = sand.u32 (!%p1387_p4), 1, %s1198_s19  }
  0x5f   : > { %s1435_s13 = sshll.u32 (!%p1387_p4), %s1432_s20, 3  ;;  %s331_s17 = scalar_lea.sflag (!%p1387_p4), [#allocation3], %s1432_s20 }
  0x60   : > { %s334_s7 = scalar_lea.vmem (!%p1387_p4), [#allocation2], %s1435_s13 }
  0x63   : > { %1173 = dma.done.wait (%p1328_p8), %s331_s17, 128  }
  0x64   : > { %1175 = vsyncadd (%p1328_p8), %s331_s17, 4294967168  ;;  %s339_s27 = sand.u32 1, %s1304_s26   ;;  %s343_s28 = scalar_lea.vmem [#allocation5], %s1435_s13 }
  0x65   : > { %s340_s23 = scalar_lea.sflag [#allocation6], %s339_s27 }
  0x66   : > { %1177 = dma.done.wait (%p1328_p8), %s340_s23, 256  }
  0x67   : > { %1179 = vsyncadd (%p1328_p8), %s340_s23, 4294967040  ;;  %s843_s14 = sshll.u32 %s1432_s20, 1  ;;  %s352_s15 = scalar_lea.vmem [#allocation7], %s1435_s13 }
  0x68   : > { %s358_s10 = scalar_lea.sflag [#allocation9], %s1432_s20  ;;  %s361_s16 = scalar_lea.vmem [#allocation8], %s843_s14 }
  0x69   : > { %1181 = dma.done.wait (%p1328_p8), %s358_s10, 32  }
  0x6a   : > { %1183 = vsyncadd (%p1328_p8), %s358_s10, 4294967264  ;;  %v1228_v0 = vmov 0.0   ;;  %vm1229_vm0 = vmmov 0   ;;  %vm413_vm1 = vcmask 261120   ;;  %v411_v1 = vld [vmem:[%s343_s28] sm:$0xff]  ;;  %v410_v2 = vld [vmem:[%s334_s7] sm:$0xff] }
  0x6b   : > { %861 = vmatprep.subr.mxu0 %v1228_v0  ;;  %863 = vmatprep.mubr.msk.f32.mxu0 %vm1229_vm0, %v1228_v0  ;;  %v491_v3 = vld [vmem:[%s361_s16] sm:$0x3]  ;;  %v1230_v4 = vmov 0   ;;  %vm497_vm4 = vcmask 64512   ;;  %v412_v17 = vld [vmem:[%s352_s15] sm:$0xff]  ;;  %s407_s26 = scalar_lea.vmem [#allocation11], %s1435_s13 }
  0x6c   : > { %866 = vmatprep.subr.mxu1 %v1228_v0  ;;  %868 = vmatprep.mubr.msk.f32.mxu1 %vm1229_vm0, %v1228_v0  ;;  %vm492_vm2 = vnez %v491_v3  ;;  %s851_s8 = sshll.u32 %s1210_s22, 1  ;;  %s625_s25 = sshll.u32 %s407_s26, 4  ;;  %s626_s25 = int_to_ptr.vmem [resolvable:$true] %s625_s25 }
  0x6d   : > { %862 = vmatpush3.xpose.msk.msra.mxu0 %vm413_vm1, %v411_v1  ;;  %v493_v5 = vsel %vm492_vm2, 16843009, %v1230_v4  ;;  %867 = vmatpush3.msra.mxu1 %v412_v17  ;;  %s1467_s24 = sadd.s32 %s1206_s21, %s851_s8  ;;  %s593_s6 = scalar_lea.sflag [#allocation12], %s1432_s20 }
  0x6e   : > { %v494_v6 = vunpack.c.0.s8 %v493_v5  ;;  %s852_s29 = sshll.u32 %s1467_s24, 7  ;;  %s1088_s30 = scalar_lea.vmem %s626_s25, 128 }
  0x6f   : > { %s623_s18 = scalar_lea.hbm %s1553_s5, %s852_s29  ;;  %p1089_p8 = scmp.ne.s32.totalorder %s626_s25, %s1088_s30 }
  0x70   : > { %864 = vmatmul.mubr.msk.f32.vlgmr.msra.gmra.mxu0 %vm413_vm1, %v410_v2  ;;  %vm495_vm3 = vcmp.ne.s32.totalorder %v494_v6, 0  ;;  %s1231_s12 = smov [#allocation11]  }
  0x71   : > { %p1090_p0 = pnand %p1089_p8, %p1332_p9  ;;  %s1092_s22 = sshll.u32 %s1231_s12, 4  ;;  %s1093_s22 = int_to_ptr.vmem [resolvable:$false] %s1092_s22 }
  0x72   : > { %s1094_s21 = scalar_lea.vmem %s1093_s22, 256  ;;  %p1095_p4 = scmp.lt.s32.totalorder %s626_s25, %s1093_s22 }
  0x73   : > { %p1091_p3 = pneg %p1090_p0  ;;  %p1096_p10 = scmp.lt.s32.totalorder %s1094_s21, %s1088_s30 }
  0x75   : > { %p1097_p11 = por %p1096_p10, %p1095_p4 }
  0x77   : > { %p1098_p13 = pnand %p1097_p11, %p1091_p3 }
 0x130   : > { %v486_v7 = vpop.f32.mrf.mxu0 }
 0x131   : > { %v490_v8 = vmul.f32 0.17677669, %v486_v7 }
 0x132   : > { %v865_v9 = vpop.f32.mrf.mxu0 }
 0x133   : > { %v496_v10 = vsel %vm495_vm3, -1e+09, %v490_v8 }
 0x134   : > { %v498_v11 = vsel %vm497_vm4, %v496_v10, -inf }
 0x135   : > { %499 = vmax.xlane.f32.xlu0 %v498_v11 }
 0x1be   : > { %v500_v12 = vpop.xlane.xlu0 %499 }
 0x1bf   : > { %v501_v13 = vsub.f32 %v496_v10, %v500_v12 }
 0x1c1   : > { %v502_v14 = vmul.f32 1.442695, %v501_v13 }
 0x1c3   : > { %972 = vpow2.f32 %v502_v14 }
 0x1d0   : > { %v973_v15 = vpop.eup %972 }
 0x1d1   : > { %v504_v16 = vsel %vm497_vm4, %v973_v15, 0.0 }
 0x1d2   : > { %505 = vadd.xlane.f32.xlu0 %v504_v16 }
 0x25b   : > { %v506_v18 = vpop.xlane.xlu0 %505 }
 0x25c   : > { %974 = vrcp.f32 %v506_v18 }
 0x269   : > { %v975_v19 = vpop.eup %974 }
 0x26a   : > { %v508_v20 = vmul.f32 %v975_v19, %v506_v18 }
 0x26c   : > { %v509_v21 = vsub.f32 2.0, %v508_v20 }
 0x26e   : > { %v510_v22 = vmul.f32 %v975_v19, %v509_v21 }
 0x270   : > { %v511_v23 = vmul.f32 %v973_v15, %v510_v22 }
 0x272   : > { %869 = vmatmul.mubr.msk.f32.vlgmr.msra.gmra.mxu1 %vm497_vm4, %v511_v23  ;;  %585 = vst.msk [vmem:[%s407_s26] sm:$0xff] %vm497_vm4, %v511_v23 }
 0x273   : > { %1101 = shalt.err (!%p1098_p13)
}
 0x274   : > { %s1102_s17 = scalar_lea.hbm %s623_s18, 128  ;;  %s1106_s23 = scalar_lea.hbm %s1553_s5, 512 }
 0x275   : > { %p1103_p5 = scmp.ne.s32.totalorder %s623_s18, %s1102_s17  ;;  %p1107_p6 = scmp.lt.s32.totalorder %s623_s18, %s1553_s5 }
 0x276   : > { %p1108_p7 = scmp.lt.s32.totalorder %s1106_s23, %s1102_s17 }
 0x277   : > { %p1104_p1 = pnand %p1103_p5, %p1332_p9 }
 0x278   : > { %p1109_p8 = por %p1108_p7, %p1107_p6 }
 0x279   : > { %p1105_p2 = pneg %p1104_p1 }
 0x27b   : > { %p1110_p0 = pnand %p1109_p8, %p1105_p2 }
 0x27d   : > { %1113 = shalt.err (!%p1110_p0)
}
 0x27e   : > { %880 = dma.vmem_to_hbm [thread:$0]  (%p1332_p9), %s626_s25, 128, %s623_s18, %s593_s6  }
 0x27f   : > { %s400_s15 = scalar_lea.vmem [#allocation10], %s1435_s13  ;;  %s1494_s8 = scalar_lea.hbm %s1552_s4, %s852_s29 }
 0x280   : > { %s609_s10 = sshll.u32 %s400_s15, 4  ;;  %s588_s1 = scalar_lea.sflag [#allocation4], %s1432_s20  ;;  %s1496_s10 = int_to_ptr.vmem [resolvable:$true] %s609_s10 }
 0x281   : > { %s1114_s11 = scalar_lea.vmem %s1496_s10, 128  ;;  %s1232_s13 = smov [#allocation10]  }
 0x282   : > { %p1115_p3 = scmp.ne.s32.totalorder %s1496_s10, %s1114_s11  ;;  %s1118_s24 = sshll.u32 %s1232_s13, 4  ;;  %s1119_s24 = int_to_ptr.vmem [resolvable:$false] %s1118_s24 }
 0x283   : > { %s1120_s29 = scalar_lea.vmem %s1119_s24, 256  ;;  %p1121_p11 = scmp.lt.s32.totalorder %s1496_s10, %s1119_s24 }
 0x284   : > { %p1116_p4 = pnand %p1115_p3, %p1332_p9  ;;  %p1122_p13 = scmp.lt.s32.totalorder %s1120_s29, %s1114_s11 }
 0x286   : > { %p1117_p10 = pneg %p1116_p4  ;;  %p1123_p5 = por %p1122_p13, %p1121_p11 }
 0x288   : > { %p1124_p1 = pnand %p1123_p5, %p1117_p10 }
 0x332   : > { %v581_v24 = vpop.f32.mrf.mxu1 }
 0x333   : > { %586 = vst.msk [vmem:[%s400_s15] sm:$0xff] %vm413_vm1, %v581_v24 }
 0x334   : > { %v870_v25 = vpop.f32.mrf.mxu1 }
 0x335   : > { %1127 = shalt.err (!%p1124_p1)
}
 0x336   : > { %s1128_s18 = scalar_lea.hbm %s1494_s8, 128  ;;  %s1132_s6 = scalar_lea.hbm %s1552_s4, 512 }
 0x337   : > { %p1129_p2 = scmp.ne.s32.totalorder %s1494_s8, %s1128_s18  ;;  %p1133_p8 = scmp.lt.s32.totalorder %s1494_s8, %s1552_s4 }
 0x338   : > { %p1134_p0 = scmp.lt.s32.totalorder %s1132_s6, %s1128_s18 }
 0x339   : > { %p1130_p6 = pnand %p1129_p2, %p1332_p9 }
 0x33a   : > { %p1135_p3 = por %p1134_p0, %p1133_p8 }
 0x33b   : > { %p1131_p7 = pneg %p1130_p6 }
 0x33d   : > { %p1136_p4 = pnand %p1135_p3, %p1131_p7 }
 0x33f   : > { %1139 = shalt.err (!%p1136_p4)
}
 0x340   : > { %879 = dma.vmem_to_hbm [thread:$0]  (%p1332_p9), %s1496_s10, 128, %s1494_s8, %s588_s1  }
 0x341 PF: > { %s1580_s22 = sld [smem:[#allocation22_spill]] }
 0x342   : > { %s1581_s21 = sld [smem:[#allocation18_spill]] }
 0x347   : > { %p904_p10 = scmp.ge.s32.totalorder %s1580_s22, 2 }
 0x348   : > { %s637_s7 = sand.u32 1, %s1581_s21  }
 0x349   : > { %p897_p11 = pnand %p904_p10, %p1338_p12  ;;  %s638_s27 = scalar_lea.sflag [#allocation4], %s637_s7 }
 0x34b   : > { %p898_p13 = pneg %p897_p11 }
 0x34d   : > { %1185 = dma.done.wait (%p898_p13), %s638_s27, 128  }
 0x34e   : > { %1187 = vsyncadd (%p898_p13), %s638_s27, 4294967168  ;;  %s647_s23 = scalar_lea.sflag [#allocation12], %s637_s7 }
 0x34f   : > { %1189 = dma.done.wait (%p898_p13), %s647_s23, 128  }
 0x350   : > { %1191 = vsyncadd (%p898_p13), %s647_s23, 4294967168  ;;  %s31_s25 = sadd.s32 1, %s1580_s22   ;;  %s1583_s9 = sld [smem:[#allocation19_spill]] }
 0x351   : > { %p28_p5 = scmp.ge.s32.totalorder %s31_s25, 6   ;;  %s1584_s20 = sld [smem:[#allocation26_spill]] }
 0x352   : > { %s1585_s21 = sld [smem:[#allocation20_spill]]  ;;  %s1589_s18 = smov %s1198_s19 }
 0x353   : > { %s1586_s22 = sld [smem:[#allocation21_spill]]  ;;  %30 = sbr.rel (!%p28_p5) target bundleno = 15 (0xf), region = 135 }
 0x354   : > { %s1587_s23 = sld [smem:[#allocation23_spill]] }
 0x355   : > { %s1588_s24 = sld [smem:[#allocation24_spill]] }
 0x356   : > { %s1590_s19 = smov %s1583_s9 }
 0x358   :  { %652 = vsyncpa [#allocation3], 1 }
 0x359   :  { %654 = vsyncpa [#allocation3 + $0x1], 1 }
 0x35a   :  { %655 = vsyncpa [#allocation6], 1 }
 0x35b   :  { %657 = vsyncpa [#allocation6 + $0x1], 1 }
 0x35c   :  { %658 = vsyncpa [#allocation9], 1 }
 0x35d   :  { %660 = vsyncpa [#allocation9 + $0x1], 1 }
 0x35e   :  { %661 = vsyncpa [#allocation4], 1 }
 0x35f   :  { %663 = vsyncpa [#allocation4 + $0x1], 1 }
 0x360   :  { %664 = vsyncpa [#allocation12], 1 }
 0x361   :  { %666 = vsyncpa [#allocation12 + $0x1], 1 }

</bundles_post_ra>
